<compile_context>
chip_gen: v6e
topology: v6e:2x2x1
jax: 0.10.0
libtpu: 0.0.40
codegen_flags: <defaults>
</compile_context>

<pallas_src>
import functools

import jax
import jax.numpy as jnp
from jax.experimental import pallas as pl
from jax.experimental.pallas import tpu as pltpu


def _simheader_kernel(x_ref, w_ref, b_ref, g_ref, beta_ref, o_ref, acc_ref, *, eps):
    # x_ref:    (block_b, block_k)   native dtype (e.g. bf16)
    # w_ref:    (block_k, out_dim)   native dtype
    # b_ref, g_ref, beta_ref: (1, out_dim)
    # o_ref:    (block_b, out_dim)
    # acc_ref:  (block_b, out_dim)   f32 scratch, resident across the k axis
    k = pl.program_id(1)

    @pl.when(k == 0)
    def _():
        acc_ref[...] = jnp.zeros_like(acc_ref)

    # MXU matmul in native dtype, f32 accumulation.
    acc_ref[...] += jnp.dot(x_ref[...], w_ref[...],
                            preferred_element_type=jnp.float32)

    @pl.when(k == pl.num_programs(1) - 1)
    def _():
        # Bias + LayerNorm epilogue, all in f32 (params cast once per tile).
        y = acc_ref[...] + b_ref[...].astype(jnp.float32)
        mean = jnp.mean(y, axis=-1, keepdims=True)
        centered = y - mean
        var = jnp.mean(centered * centered, axis=-1, keepdims=True)
        inv = jax.lax.rsqrt(var + eps)  # EUP rsqrt: separate VLIW slot
        out = (centered * inv) * g_ref[...].astype(jnp.float32) \
              + beta_ref[...].astype(jnp.float32)
        o_ref[...] = out.astype(o_ref.dtype)


def _round_up(x, m):
    return (x + m - 1) // m * m


def sim_header_forward(x, weight, bias, gamma, beta, *, eps=1e-6,
                       block_b=None, block_k=None, vmem_limit_bytes=None):
    """Pallas implementation of SimHeader.forward.

    x:      [B, in_dim]
    weight: [in_dim, out_dim]   (transposed relative to nn.Linear.weight)
    bias:   [out_dim]
    gamma:  [out_dim]           (LayerNorm weight)
    beta:   [out_dim]           (LayerNorm bias)

    Returns a 1-tuple (out,) with out of shape [B, out_dim].
    For best performance keep in_dim / out_dim multiples of 128 (lane-dense).
    """
    B, in_dim = x.shape
    k_dim, out_dim = weight.shape
    assert k_dim == in_dim

    # Batch tile: multiple of 8 sublanes; 256 is a good default sweep point.
    if block_b is None:
        block_b = min(256, _round_up(B, 8))
    block_b = max(8, _round_up(block_b, 8))

    # K tile: keep the whole weight resident unless asked to split (v7x VMEM).
    if block_k is None:
        block_k = in_dim
    assert in_dim % block_k == 0, "block_k must divide in_dim"
    assert block_k == in_dim or block_k % 128 == 0, "K tiles must be lane-aligned"
    num_k = in_dim // block_k

    # Pad the batch so the grid covers it exactly; padded rows sliced off below.
    Bp = _round_up(B, block_b)
    if Bp != B:
        x = jnp.pad(x, ((0, Bp - B), (0, 0)))
    num_b = Bp // block_b

    # 1-D params presented as [1, out_dim] so they map onto (sublane, lane).
    b2 = bias.reshape(1, out_dim)
    g2 = gamma.reshape(1, out_dim)
    be2 = beta.reshape(1, out_dim)

    def invariant_spec(shape):
        # Constant index_map across the grid -> single-buffer (no re-fetch,
        # half the VMEM footprint of the default double buffering).
        return pl.BlockSpec(shape, lambda i, k: (0, 0),
                            pipeline_mode=pl.Buffered(1))

    if num_k == 1:
        w_spec = invariant_spec((block_k, out_dim))
    else:
        w_spec = pl.BlockSpec((block_k, out_dim), lambda i, k: (k, 0))

    kernel = functools.partial(_simheader_kernel, eps=eps)

    flops = 2 * Bp * in_dim * out_dim
    bytes_accessed = (x.size * x.dtype.itemsize
                      + weight.size * weight.dtype.itemsize
                      + (b2.size + g2.size + be2.size) * 4
                      + Bp * out_dim * x.dtype.itemsize)

    out = pl.pallas_call(
        kernel,
        out_shape=jax.ShapeDtypeStruct((Bp, out_dim), x.dtype),
        grid=(num_b, num_k),
        in_specs=[
            pl.BlockSpec((block_b, block_k), lambda i, k: (i, k)),  # x tile
            w_spec,                                                 # weight
            invariant_spec((1, out_dim)),                           # bias
            invariant_spec((1, out_dim)),                           # ln gamma
            invariant_spec((1, out_dim)),                           # ln beta
        ],
        out_specs=pl.BlockSpec((block_b, out_dim), lambda i, k: (i, 0)),
        scratch_shapes=[pltpu.VMEM((block_b, out_dim), jnp.float32)],
        compiler_params=pltpu.CompilerParams(
            dimension_semantics=("parallel", "arbitrary"),
            vmem_limit_bytes=vmem_limit_bytes,
        ),
        cost_estimate=pl.CostEstimate(
            flops=flops, transcendentals=Bp, bytes_accessed=bytes_accessed),
    )(x, weight, b2, g2, be2)

    if Bp != B:
        out = out[:B]
    return (out,)


if __name__ == "__main__":
    key = jax.random.PRNGKey(0)
    k_x, k_w, k_b = jax.random.split(key, 3)

    eps = 1e-6

    def reference(x, w, b, g, be):
        y = x.astype(jnp.float32) @ w.astype(jnp.float32) + b
        mean = y.mean(axis=-1, keepdims=True)
        var = ((y - mean) ** 2).mean(axis=-1, keepdims=True)
        return (y - mean) / jnp.sqrt(var + eps) * g + be

    # --- Config 1: f32, lane-dense, batch tiled into 2 grid steps -----------
    B, in_dim, out_dim = 16, 128, 128
    x = jax.random.normal(k_x, (B, in_dim), dtype=jnp.float32)
    weight = 0.02 * jax.random.normal(k_w, (in_dim, out_dim), dtype=jnp.float32)
    bias = 0.01 * jax.random.normal(k_b, (out_dim,), dtype=jnp.float32)
    gamma = jnp.ones((out_dim,), dtype=jnp.float32)
    beta = jnp.zeros((out_dim,), dtype=jnp.float32)

    (out_f32,) = sim_header_forward(x, weight, bias, gamma, beta,
                                    eps=eps, block_b=8)
    out_f32 = jax.block_until_ready(out_f32)
    ref = reference(x, weight, bias, gamma, beta)
    assert out_f32.shape == (B, out_dim)
    assert jnp.allclose(out_f32, ref, atol=1e-4, rtol=1e-4)

    # --- Config 2: bf16 MXU operands (f32 accumulation), K-tiled ------------
    B2, in_dim2, out_dim2 = 16, 256, 128
    x2 = jax.random.normal(k_x, (B2, in_dim2), dtype=jnp.bfloat16)
    w2 = (0.02 * jax.random.normal(k_w, (in_dim2, out_dim2),
                                   dtype=jnp.float32)).astype(jnp.bfloat16)
    b2_ = 0.01 * jax.random.normal(k_b, (out_dim2,), dtype=jnp.float32)
    g2_ = jnp.ones((out_dim2,), dtype=jnp.float32)
    be2_ = jnp.zeros((out_dim2,), dtype=jnp.float32)

    (out_bf16,) = sim_header_forward(x2, w2, b2_, g2_, be2_,
                                     eps=eps, block_b=8, block_k=128)
    out_bf16 = jax.block_until_ready(out_bf16)
    ref_bf16 = reference(x2, w2, b2_, g2_, be2_)
    assert out_bf16.shape == (B2, out_dim2)
    assert jnp.allclose(out_bf16.astype(jnp.float32), ref_bf16,
                        atol=5e-2, rtol=5e-2)

    # --- Config 3: non-divisible batch exercises the padding path -----------
    x3 = x[:13]
    (out_odd,) = sim_header_forward(x3, weight, bias, gamma, beta,
                                    eps=eps, block_b=8)
    out_odd = jax.block_until_ready(out_odd)
    assert out_odd.shape == (13, out_dim)
    assert jnp.allclose(out_odd, ref[:13], atol=1e-4, rtol=1e-4)

    print("KERNEL_OK")
</pallas_src>

<mosaic_0001>
module attributes {stable_mosaic.version = 11 : i64} {
  func.func @_simheader_kernel(%arg0: i32, %arg1: i32, %arg2: memref<8x128xf32, #tpu.memory_space<vmem>>, %arg3: memref<128x128xf32, #tpu.memory_space<vmem>>, %arg4: memref<1x128xf32, #tpu.memory_space<vmem>>, %arg5: memref<1x128xf32, #tpu.memory_space<vmem>>, %arg6: memref<1x128xf32, #tpu.memory_space<vmem>>, %arg7: memref<8x128xf32, #tpu.memory_space<vmem>>, %arg8: memref<8x128xf32, #tpu.memory_space<vmem>>) attributes {dimension_semantics = [#tpu.dimension_semantics<parallel>, #tpu.dimension_semantics<arbitrary>], iteration_bounds = array<i64: 2, 1>, scalar_prefetch = 0 : i64, scratch_operands = 1 : i64, tpu.core_type = #tpu.core_type<tc>, window_params = [{transform_indices = @transform_0, window_bounds = array<i64: 8, 128>}, {pipeline_mode = #tpu.pipeline_mode<synchronous>, transform_indices = @transform_1, window_bounds = array<i64: 128, 128>}, {pipeline_mode = #tpu.pipeline_mode<synchronous>, transform_indices = @transform_2, window_bounds = array<i64: 1, 128>}, {pipeline_mode = #tpu.pipeline_mode<synchronous>, transform_indices = @transform_3, window_bounds = array<i64: 1, 128>}, {pipeline_mode = #tpu.pipeline_mode<synchronous>, transform_indices = @transform_4, window_bounds = array<i64: 1, 128>}, {transform_indices = @transform_5, window_bounds = array<i64: 8, 128>}]} {
    %c0_i32 = arith.constant 0 : i32
    %0 = arith.cmpi eq, %arg1, %c0_i32 : i32
    %1 = arith.extui %0 : i1 to i32
    %c0_i32_0 = arith.constant 0 : i32
    %2 = arith.cmpi ne, %1, %c0_i32_0 : i32
    scf.if %2 {
      %cst_10 = arith.constant 0.000000e+00 : f32
      %12 = vector.broadcast %cst_10 : f32 to vector<8x128xf32>
      %c0_11 = arith.constant 0 : index
      %c0_12 = arith.constant 0 : index
      %13 = vector.load %arg8[%c0_11, %c0_12] : memref<8x128xf32, #tpu.memory_space<vmem>>, vector<8x128xf32>
      tpu.vector_store %arg8[%c0_11, %c0_12], %12 {strides = array<i32>} : memref<8x128xf32, #tpu.memory_space<vmem>>, vector<8x128xf32>,
    } else {
    }
    %c0 = arith.constant 0 : index
    %c0_1 = arith.constant 0 : index
    %3 = vector.load %arg8[%c0, %c0_1] : memref<8x128xf32, #tpu.memory_space<vmem>>, vector<8x128xf32>
    %c0_2 = arith.constant 0 : index
    %c0_3 = arith.constant 0 : index
    %4 = vector.load %arg2[%c0_2, %c0_3] : memref<8x128xf32, #tpu.memory_space<vmem>>, vector<8x128xf32>
    %c0_4 = arith.constant 0 : index
    %c0_5 = arith.constant 0 : index
    %5 = vector.load %arg3[%c0_4, %c0_5] : memref<128x128xf32, #tpu.memory_space<vmem>>, vector<128x128xf32>
    %cst = arith.constant dense<0.000000e+00> : vector<8x128xf32>
    %6 = tpu.matmul %4, %5, %cst {dimension_numbers = #tpu.dot_dimension_numbers<[1], [0], [0], [1], [0, 0, 1, 1], [], []>} : vector<8x128xf32>, vector<128x128xf32>, vector<8x128xf32> -> vector<8x128xf32>
    %7 = arith.addf %3, %6 : vector<8x128xf32>
    %c0_6 = arith.constant 0 : index
    %c0_7 = arith.constant 0 : index
    %8 = vector.load %arg8[%c0_6, %c0_7] : memref<8x128xf32, #tpu.memory_space<vmem>>, vector<8x128xf32>
    tpu.vector_store %arg8[%c0_6, %c0_7], %7 {strides = array<i32>} : memref<8x128xf32, #tpu.memory_space<vmem>>, vector<8x128xf32>,
    %c0_i32_8 = arith.constant 0 : i32
    %9 = arith.cmpi eq, %arg1, %c0_i32_8 : i32
    %10 = arith.extui %9 : i1 to i32
    %c0_i32_9 = arith.constant 0 : i32
    %11 = arith.cmpi ne, %10, %c0_i32_9 : i32
    scf.if %11 {
      %c0_10 = arith.constant 0 : index
      %c0_11 = arith.constant 0 : index
      %12 = vector.load %arg8[%c0_10, %c0_11] : memref<8x128xf32, #tpu.memory_space<vmem>>, vector<8x128xf32>
      %c0_12 = arith.constant 0 : index
      %c0_13 = arith.constant 0 : index
      %13 = vector.load %arg4[%c0_12, %c0_13] : memref<1x128xf32, #tpu.memory_space<vmem>>, vector<1x128xf32>
      %14 = vector.broadcast %13 : vector<1x128xf32> to vector<8x128xf32>
      %15 = arith.addf %12, %14 : vector<8x128xf32>
      %cst_14 = arith.constant dense<0.000000e+00> : vector<8xf32>
      %16 = vector.multi_reduction <add>, %15, %cst_14 [1] : vector<8x128xf32> to vector<8xf32>
      %17 = vector.shape_cast %16 : vector<8xf32> to vector<8x1xf32>
      %cst_15 = arith.constant 1.280000e+02 : f32
      %18 = vector.broadcast %cst_15 : f32 to vector<8x1xf32>
      %19 = arith.divf %17, %18 : vector<8x1xf32>
      %20 = vector.broadcast %19 : vector<8x1xf32> to vector<8x128xf32>
      %21 = arith.subf %15, %20 : vector<8x128xf32>
      %22 = arith.mulf %21, %21 : vector<8x128xf32>
      %cst_16 = arith.constant dense<0.000000e+00> : vector<8xf32>
      %23 = vector.multi_reduction <add>, %22, %cst_16 [1] : vector<8x128xf32> to vector<8xf32>
      %24 = vector.shape_cast %23 : vector<8xf32> to vector<8x1xf32>
      %cst_17 = arith.constant 1.280000e+02 : f32
      %25 = vector.broadcast %cst_17 : f32 to vector<8x1xf32>
      %26 = arith.divf %24, %25 : vector<8x1xf32>
      %cst_18 = arith.constant 9.99999997E-7 : f32
      %27 = vector.broadcast %cst_18 : f32 to vector<8x1xf32>
      %28 = arith.addf %26, %27 : vector<8x1xf32>
      %29 = math.rsqrt %28 : vector<8x1xf32>
      %30 = vector.broadcast %29 : vector<8x1xf32> to vector<8x128xf32>
      %31 = arith.mulf %21, %30 : vector<8x128xf32>
      %c0_19 = arith.constant 0 : index
      %c0_20 = arith.constant 0 : index
      %32 = vector.load %arg5[%c0_19, %c0_20] : memref<1x128xf32, #tpu.memory_space<vmem>>, vector<1x128xf32>
      %33 = vector.broadcast %32 : vector<1x128xf32> to vector<8x128xf32>
      %34 = arith.mulf %31, %33 : vector<8x128xf32>
      %c0_21 = arith.constant 0 : index
      %c0_22 = arith.constant 0 : index
      %35 = vector.load %arg6[%c0_21, %c0_22] : memref<1x128xf32, #tpu.memory_space<vmem>>, vector<1x128xf32>
      %36 = vector.broadcast %35 : vector<1x128xf32> to vector<8x128xf32>
      %37 = arith.addf %34, %36 : vector<8x128xf32>
      %c0_23 = arith.constant 0 : index
      %c0_24 = arith.constant 0 : index
      %38 = vector.load %arg7[%c0_23, %c0_24] : memref<8x128xf32, #tpu.memory_space<vmem>>, vector<8x128xf32>
      tpu.vector_store %arg7[%c0_23, %c0_24], %37 {strides = array<i32>} : memref<8x128xf32, #tpu.memory_space<vmem>>, vector<8x128xf32>,
    } else {
    }
    return
  }
  func.func @transform_0(%arg0: i32, %arg1: i32) -> (i32, i32) {
    %c0_i32 = arith.constant 0 : i32
    return %arg0, %arg1 : i32, i32
  }
  func.func @transform_1(%arg0: i32, %arg1: i32) -> (i32, i32) {
    %c0_i32 = arith.constant 0 : i32
    %c0_i32_0 = arith.constant 0 : i32
    %c0_i32_1 = arith.constant 0 : i32
    return %c0_i32, %c0_i32_0 : i32, i32
  }
  func.func @transform_2(%arg0: i32, %arg1: i32) -> (i32, i32) {
    %c0_i32 = arith.constant 0 : i32
    %c0_i32_0 = arith.constant 0 : i32
    %c0_i32_1 = arith.constant 0 : i32
    return %c0_i32, %c0_i32_0 : i32, i32
  }
  func.func @transform_3(%arg0: i32, %arg1: i32) -> (i32, i32) {
    %c0_i32 = arith.constant 0 : i32
    %c0_i32_0 = arith.constant 0 : i32
    %c0_i32_1 = arith.constant 0 : i32
    return %c0_i32, %c0_i32_0 : i32, i32
  }
  func.func @transform_4(%arg0: i32, %arg1: i32) -> (i32, i32) {
    %c0_i32 = arith.constant 0 : i32
    %c0_i32_0 = arith.constant 0 : i32
    %c0_i32_1 = arith.constant 0 : i32
    return %c0_i32, %c0_i32_0 : i32, i32
  }
  func.func @transform_5(%arg0: i32, %arg1: i32) -> (i32, i32) {
    %c0_i32 = arith.constant 0 : i32
    %c0_i32_0 = arith.constant 0 : i32
    return %arg0, %c0_i32 : i32, i32
  }
}

</mosaic_0001>

<bundles_post_ra>
// kernel: tpu_custom_call.1
= control target key start
LH: loop header
LB: loop body
LE: loop exit
PB: predicated region body
PF: predicated region fallthrough
CT: control target
= control target key end

     0   :  { %s1018_s0 = inlined_call_operand.hbm [shape: f32[16,128], index: 0, kind: input, shape index: {}]   ;;  %s1019_s1 = inlined_call_operand.hbm [shape: f32[128,128], index: 1, kind: input, shape index: {}]   ;;  %s1020_s2 = inlined_call_operand.vmem [shape: f32[1,128], index: 2, kind: input, shape index: {}]   ;;  %s1021_s3 = inlined_call_operand.vmem [shape: f32[1,128], index: 3, kind: input, shape index: {}]   ;;  %s1022_s4 = inlined_call_operand.vmem [shape: f32[1,128], index: 4, kind: input, shape index: {}]   ;;  %s1023_s5 = inlined_call_operand.hbm [shape: f32[16,128], index: 5, kind: output, shape index: {}]  }
   0x1   :  { %1026 = sst [smem:[#allocation13_spill]] %s1019_s1 }
   0x2   :  { %10 = vsyncpa [#allocation4], 0 }
   0x3   :  { %12 = vsyncpa [#allocation4 + $0x1], 0 }
   0x4   :  { %13 = vsyncpa [#allocation7], 0 }
   0x5   :  { %14 = vsyncpa [#allocation5], 0 }
   0x6   :  { %16 = vsyncpa [#allocation5 + $0x1], 0  ;;  %s835_s18 = smov 0   ;;  %s837_s19 = smov 0  }
   0x7   :  { %s839_s20 = smov 0   ;;  %s841_s21 = smov 0  }
   0x8   :  { %s843_s22 = smov 0   ;;  %s845_s23 = smov 0  }
   0x9 LB: > { %s509_s24 = sadd.s32 4294967295, %s796_s23   ;;  %s510_s25 = sadd.s32 4294967294, %s796_s23   ;;  %s796_s23 = sphi %s845_s23, %s22_s23   ;;  %s792_s22 = sphi %s843_s22, %s1046_s22   ;;  %s788_s21 = sphi %s841_s21, %s1045_s21   ;;  %s784_s20 = sphi %s839_s20, %s1044_s20   ;;  %s780_s19 = sphi %s837_s19, %s1043_s19   ;;  %s776_s18 = sphi %s835_s18, %s1042_s18  }
   0xa   : > { %p56_p0 = scmp.ne.s32.totalorder %s780_s19, %s776_s18  ;;  %p869_p1 = scmp.eq.s32.totalorder %s509_s24, 0 }
   0xb   : > { %p873_p2 = scmp.eq.s32.totalorder %s509_s24, 1  ;;  %p170_p3 = scmp.eq.s32.totalorder %s510_s25, 1 }
   0xc   : > { %p879_p4 = por %p869_p1, %p56_p0  ;;  %p511_p5 = scmp.ge.s32.totalorder %s796_s23, 1 }
   0xd   : > { %p884_p6 = por %p170_p3, %p56_p0  ;;  %p177_p7 = scmp.lt.s32.totalorder %s796_s23, 3 }
   0xe   : > { %s1029_s28 = scalar_select %p879_p4, 1, 0 }
   0xf   : > { %s1030_s29 = scalar_select %p884_p6, 1, 0 }
  0x10   : > { %p889_p8 = pnand %p511_p5, %p177_p7  ;;  %s798_s6 = smov [#allocation6]  }
  0x11   : > { %s189_s7 = sshll.u32 %s798_s6, 4  ;;  %s34_s9 = sadd.s32 1, %s792_s22  ;;  %s190_s7 = int_to_ptr.vmem [resolvable:$true] %s189_s7 }
  0x12   : > { %p587_p9 = pneg %p889_p8  ;;  %s669_s10 = scalar_lea.vmem %s190_s7, 2048 }
  0x13   : > { %p670_p13 = scmp.ne.s32.totalorder %s190_s7, %s669_s10  ;;  %p677_p5 = scmp.lt.s32.totalorder %s190_s7, %s190_s7 }
  0x14   : > { %p898_p11 = pnand %p587_p9, %p869_p1  ;;  %p678_p7 = scmp.lt.s32.totalorder %s669_s10, %s669_s10 }
  0x16   : > { %p660_p12 = pneg %p898_p11  ;;  %p679_p6 = por %p678_p7, %p677_p5 }
  0x18   : > { %p672_p0 = pnand %p670_p13, %p660_p12 }
  0x1a   : > { %p673_p3 = pneg %p672_p0 }
  0x1c   : > { %p680_p4 = pnand %p679_p6, %p673_p3 }
  0x1e   : > { %683 = shalt.err (!%p680_p4)
}
  0x1f   : > { %s799_s11 = smov 128   ;;  %s800_s12 = smov 8  }
  0x20   : > { %s1033_s1 = sld [smem:[#allocation13_spill]]  ;;  %p36_p6 = scmp.ge.s32.totalorder %s34_s9, 2 }
  0x21   : > { %s43_s15 = sadd.s32 1, %s784_s20  ;;  %p50_p4 = scmp.ne.s32.totalorder %s784_s20, %s780_s19 }
  0x22   : > { %p51_p9 = scmp.eq.s32.totalorder %s796_s23, 0  ;;  %s1048_s9 = smov (%p36_p6, %s34_s9), 0 }
  0x23   : > { %1034 = sst [smem:[#allocation12_spill]] %s1048_s9  ;;  %p922_p13 = por %p873_p2, %p50_p4 }
  0x24   : > { %p916_p12 = por %p51_p9, %p50_p4  ;;  %s38_s24 = ssub.s32 %s792_s22, %s1048_s9 }
  0x25   : > { %p600_p0 = scmp.lt.s32.totalorder %s796_s23, 2  ;;  %s212_s25 = sand.u32 1, %s784_s20  }
  0x26   : > { %590 = dma.hbm_to_vmem [thread:$0]  (!%p898_p11), %s1033_s1, 2048, %s190_s7, [#allocation7], %s799_s11, %s799_s11, %s800_s12  }
  0x27   : > { %p41_p11 = scmp.eq.s32.totalorder %s38_s24, 0  ;;  %s514_s6 = sshll.u32 %s212_s25, 3 }
  0x28   : > { %s515_s8 = sshll.u32 %s792_s22, 7  ;;  %s216_s13 = scalar_lea.vmem [#allocation3], %s514_s6 }
  0x29   : > { %s931_s7 = scalar_select %p41_p11, %s784_s20, %s43_s15  }
  0x2a   : > { %s222_s12 = scalar_lea.hbm %s1018_s0, %s515_s8  ;;  %s224_s14 = sshll.u32 %s216_s13, 4  ;;  %s225_s14 = int_to_ptr.vmem [resolvable:$true] %s224_s14 }
  0x2b   : > { %p939_p2 = pnand %p600_p0, %p916_p12  ;;  %s213_s1 = scalar_lea.sflag [#allocation4], %s212_s25 }
  0x2c   : > { %s697_s24 = scalar_lea.vmem %s225_s14, 128  ;;  %s801_s15 = smov [#allocation3]  }
  0x2d   : > { %p686_p3 = pneg %p939_p2  ;;  %p698_p5 = scmp.ne.s32.totalorder %s225_s14, %s697_s24 }
  0x2e   : > { %s702_s9 = sshll.u32 %s801_s15, 4  ;;  %s703_s9 = int_to_ptr.vmem [resolvable:$false] %s702_s9 }
  0x2f   : > { %p700_p7 = pnand %p698_p5, %p686_p3  ;;  %s704_s8 = scalar_lea.vmem %s703_s9, 256 }
  0x30   : > { %p705_p4 = scmp.lt.s32.totalorder %s225_s14, %s703_s9  ;;  %p706_p9 = scmp.lt.s32.totalorder %s704_s8, %s697_s24 }
  0x31   : > { %p701_p6 = pneg %p700_p7 }
  0x32   : > { %p707_p11 = por %p706_p9, %p705_p4 }
  0x34   : > { %p708_p10 = pnand %p707_p11, %p701_p6 }
  0x36   : > { %711 = shalt.err (!%p708_p10)
}
  0x37   : > { %594 = dma.hbm_to_vmem [thread:$0]  (!%p939_p2), %s222_s12, 128, %s225_s14, %s213_s1  }
  0x38   : > { %233 = sbr.rel (%p889_p8) target bundleno = 611 (0x263), region = 40  ;;  %s950_s16 = sand.u32 (!%p889_p8), 1, %s780_s19  }
  0x39   : > { %s517_s25 = sshll.u32 (!%p889_p8), %s950_s16, 3  ;;  %s236_s6 = scalar_lea.sflag (!%p889_p8), [#allocation4], %s950_s16 }
  0x3a   : > { %s956_s9 = scalar_lea.vmem (!%p889_p8), [#allocation3], %s517_s25  ;;  %p1038_p12 = scmp.ne.s32.totalorder (!%p889_p8), %s1029_s28, 0 }
  0x3d   : > { %763 = dma.done.wait (%p1038_p12), %s236_s6, 128  }
  0x3e   : > { %765 = vsyncadd (%p1038_p12), %s236_s6, 4294967168 }
  0x3f   : > { %767 = dma.done.wait (%p869_p1), [#allocation7], 2048  }
  0x40   : > { %769 = vsyncadd (%p869_p1), [#allocation7], 4294965248  ;;  %v802_v0 = vmov 0.0   ;;  %vm803_vm0 = vmmov 0   ;;  %v292_v1 = vld [vmem:[#allocation6 + $0x78] sm:$0xff]  ;;  %v291_v2 = vld [vmem:[#allocation6 + $0x70] sm:$0xff] }
  0x41   : > { %544 = vmatprep.subr.mxu0 %v802_v0  ;;  %576 = vmatprep.mubr.msk.f32.mxu0 %vm803_vm0, %v802_v0  ;;  %v290_v3 = vld [vmem:[#allocation6 + $0x68] sm:$0xff]  ;;  %v289_v4 = vld [vmem:[#allocation6 + $0x60] sm:$0xff]  ;;  %v288_v5 = vld [vmem:[#allocation6 + $0x58] sm:$0xff]  ;;  %s524_s12 = sshll.u32 %s788_s21, 7  ;;  %s269_s13 = scalar_lea.vmem [#allocation8], %s517_s25 }
  0x42   : > { %545 = vmatpush3.msra.mxu0 %v292_v1  ;;  %v287_v6 = vld [vmem:[#allocation6 + $0x50] sm:$0xff]  ;;  %v286_v7 = vld [vmem:[#allocation6 + $0x48] sm:$0xff]  ;;  %v285_v8 = vld [vmem:[#allocation6 + $0x40] sm:$0xff]  ;;  %s420_s14 = sshll.u32 %s269_s13, 4  ;;  %s418_s15 = scalar_lea.hbm %s1023_s5, %s524_s12  ;;  %s421_s14 = int_to_ptr.vmem [resolvable:$true] %s420_s14 }
  0x43   : > { %546 = vmatprep.subr.mxu0 %v802_v0  ;;  %v284_v9 = vld [vmem:[#allocation6 + $0x38] sm:$0xff]  ;;  %v283_v10 = vld [vmem:[#allocation6 + $0x30] sm:$0xff]  ;;  %v282_v11 = vld [vmem:[#allocation6 + $0x28] sm:$0xff]  ;;  %s407_s8 = scalar_lea.sflag [#allocation5], %s950_s16  ;;  %s712_s6 = scalar_lea.vmem %s421_s14, 128 }
  0x44   : > { %547 = vmatpush3.msra.mxu0 %v291_v2  ;;  %v281_v12 = vld [vmem:[#allocation6 + $0x20] sm:$0xff]  ;;  %v280_v13 = vld [vmem:[#allocation6 + $0x18] sm:$0xff]  ;;  %v279_v14 = vld [vmem:[#allocation6 + $0x10] sm:$0xff]  ;;  %p713_p1 = scmp.ne.s32.totalorder %s421_s14, %s712_s6 }
  0x45   : > { %548 = vmatprep.subr.mxu0 %v802_v0  ;;  %v278_v15 = vld [vmem:[#allocation6 + $0x8] sm:$0xff]  ;;  %v277_v16 = vld [vmem:[#allocation6] sm:$0xff]  ;;  %v276_v17 = vld [vmem:[%s956_s9] sm:$0xff]  ;;  %s804_s9 = smov [#allocation8]  }
  0x46   : > { %549 = vmatpush3.msra.mxu0 %v290_v3  ;;  %v520_v18 = vld [vmem:[%s1020_s2] ss:$0 sm:$0xff]  ;;  %p714_p8 = pnand %p713_p1, %p922_p13  ;;  %s716_s1 = sshll.u32 %s804_s9, 4  ;;  %s717_s1 = int_to_ptr.vmem [resolvable:$false] %s716_s1 }
  0x47   : > { %550 = vmatprep.subr.mxu0 %v802_v0  ;;  %v521_v30 = vld [vmem:[%s1021_s3] ss:$0 sm:$0xff]  ;;  %s718_s21 = scalar_lea.vmem %s717_s1, 256  ;;  %p719_p0 = scmp.lt.s32.totalorder %s421_s14, %s717_s1 }
  0x48   : > { %551 = vmatpush3.msra.mxu0 %v289_v4  ;;  %v522_v32 = vld [vmem:[%s1022_s4] ss:$0 sm:$0xff]  ;;  %p715_p10 = pneg %p714_p8  ;;  %p720_p2 = scmp.lt.s32.totalorder %s718_s21, %s712_s6 }
  0x49   : > { %552 = vmatprep.subr.mxu0 %v802_v0 }
  0x4a   : > { %553 = vmatpush3.msra.mxu0 %v288_v5  ;;  %p721_p3 = por %p720_p2, %p719_p0 }
  0x4b   : > { %554 = vmatprep.subr.mxu0 %v802_v0 }
  0x4c   : > { %555 = vmatpush3.msra.mxu0 %v287_v6  ;;  %p722_p5 = pnand %p721_p3, %p715_p10 }
  0x4d   : > { %556 = vmatprep.subr.mxu0 %v802_v0 }
  0x4e   : > { %557 = vmatpush3.msra.mxu0 %v286_v7 }
  0x4f   : > { %558 = vmatprep.subr.mxu0 %v802_v0 }
  0x50   : > { %559 = vmatpush3.msra.mxu0 %v285_v8 }
  0x51   : > { %560 = vmatprep.subr.mxu0 %v802_v0 }
  0x52   : > { %561 = vmatpush3.msra.mxu0 %v284_v9 }
  0x53   : > { %562 = vmatprep.subr.mxu0 %v802_v0 }
  0x54   : > { %563 = vmatpush3.msra.mxu0 %v283_v10 }
  0x55   : > { %564 = vmatprep.subr.mxu0 %v802_v0 }
  0x56   : > { %565 = vmatpush3.msra.mxu0 %v282_v11 }
  0x57   : > { %566 = vmatprep.subr.mxu0 %v802_v0 }
  0x58   : > { %567 = vmatpush3.msra.mxu0 %v281_v12 }
  0x59   : > { %568 = vmatprep.subr.mxu0 %v802_v0 }
  0x5a   : > { %569 = vmatpush3.msra.mxu0 %v280_v13 }
  0x5b   : > { %570 = vmatprep.subr.mxu0 %v802_v0 }
  0x5c   : > { %571 = vmatpush3.msra.mxu0 %v279_v14 }
  0x5d   : > { %572 = vmatprep.subr.mxu0 %v802_v0 }
  0x5e   : > { %573 = vmatpush3.msra.mxu0 %v278_v15 }
  0x5f   : > { %574 = vmatprep.subr.mxu0 %v802_v0 }
  0x60   : > { %575 = vmatpush3.msra.mxu0 %v277_v16 }
  0x61   : > { %577 = vmatmul.mubr.f32.vlgmr.msra.gmra.mxu0 %v276_v17 }
 0x121   : > { %v359_v19 = vpop.f32.mrf.mxu0 }
 0x122   : > { %v376_v20 = vadd.f32 %v520_v18, %v359_v19 }
 0x123   : > { %v578_v21 = vpop.f32.mrf.mxu0 }
 0x124   : > { %377 = vadd.xlane.f32.xlu0 %v376_v20 }
 0x1ad   : > { %v378_v22 = vpop.xlane.xlu0 %377 }
 0x1ae   : > { %v380_v23 = vmul.f32 0.0078125, %v378_v22 }
 0x1b0   : > { %v381_v24 = vsub.f32 %v376_v20, %v380_v23 }
 0x1b2   : > { %v382_v25 = vmul.f32 %v381_v24, %v381_v24 }
 0x1b4   : > { %383 = vadd.xlane.f32.xlu0 %v382_v25 }
 0x23d   : > { %v384_v26 = vpop.xlane.xlu0 %383 }
 0x23e   : > { %v385_v27 = vmul.f32 0.0078125, %v384_v26 }
 0x240   : > { %v386_v28 = vadd.f32 1e-06, %v385_v27 }
 0x242   : > { %656 = vrsqrt.f32 %v386_v28 }
 0x24f   : > { %v657_v29 = vpop.eup %656 }
 0x250   : > { %v388_v31 = vmul.f32 %v657_v29, %v381_v24 }
 0x252   : > { %v396_v33 = vmul.f32 %v521_v30, %v388_v31 }
 0x254   : > { %v404_v34 = vadd.f32 %v522_v32, %v396_v33 }
 0x256   : > { %405 = vst [vmem:[%s269_s13] sm:$0xff] %v404_v34 }
 0x257   : > { %725 = shalt.err (!%p722_p5)
}
 0x258   : > { %s726_s25 = scalar_lea.hbm %s418_s15, 128  ;;  %s730_s28 = scalar_lea.hbm %s1023_s5, 256 }
 0x259   : > { %p727_p7 = scmp.ne.s32.totalorder %s418_s15, %s726_s25  ;;  %p731_p9 = scmp.lt.s32.totalorder %s418_s15, %s1023_s5 }
 0x25a   : > { %p732_p11 = scmp.lt.s32.totalorder %s730_s28, %s726_s25 }
 0x25b   : > { %p728_p6 = pnand %p727_p7, %p922_p13 }
 0x25c   : > { %p733_p12 = por %p732_p11, %p731_p9 }
 0x25d   : > { %p729_p4 = pneg %p728_p6 }
 0x25f   : > { %p734_p1 = pnand %p733_p12, %p729_p4 }
 0x261   : > { %737 = shalt.err (!%p734_p1)
}
 0x262   : > { %585 = dma.vmem_to_hbm [thread:$0]  (%p922_p13), %s421_s14, 128, %s418_s15, %s407_s8  }
 0x263 PF: > { %s432_s11 = sand.u32 1, %s776_s18   ;;  %p1039_p8 = scmp.ne.s32.totalorder %s1030_s29, 0 }
 0x264   : > { %p1040_p10 = scmp.ge.s32.totalorder %s796_s23, 2  ;;  %s433_s12 = scalar_lea.sflag [#allocation5], %s432_s11 }
 0x266   : > { %p596_p0 = pnand %p1040_p10, %p1039_p8 }
 0x268   : > { %p597_p2 = pneg %p596_p0 }
 0x26a   : > { %771 = dma.done.wait (%p597_p2), %s433_s12, 128  }
 0x26b   : > { %773 = vsyncadd (%p597_p2), %s433_s12, 4294967168  ;;  %s22_s23 = sadd.s32 1, %s796_s23   ;;  %s1041_s17 = sld [smem:[#allocation12_spill]] }
 0x26c   : > { %p19_p3 = scmp.ge.s32.totalorder %s22_s23, 4   ;;  %s1042_s18 = smov %s780_s19 }
 0x26d   : > { %s1043_s19 = smov %s784_s20  ;;  %s1044_s20 = smov %s931_s7 }
 0x26e   : > { %s1045_s21 = smov %s792_s22  ;;  %21 = sbr.rel (!%p19_p3) target bundleno = 9 (0x9), region = 97 }
 0x271   : > { %s1046_s22 = smov %s1041_s17 }
 0x273   :  { %438 = vsyncpa [#allocation4], 1 }
 0x274   :  { %440 = vsyncpa [#allocation4 + $0x1], 1 }
 0x275   :  { %441 = vsyncpa [#allocation7], 1 }
 0x276   :  { %442 = vsyncpa [#allocation5], 1 }
 0x277   :  { %444 = vsyncpa [#allocation5 + $0x1], 1 }

</bundles_post_ra>
